<compile_context>
chip_gen: v7x
topology: tpu7x:2x2x1
jax: 0.10.0
libtpu: 0.0.40
codegen_flags: <defaults>
</compile_context>

<pallas_src>
import functools

import jax
import jax.numpy as jnp
from jax.experimental import pallas as pl
from jax.experimental.pallas import tpu as pltpu


def _round_up(a, m):
    return -(-a // m) * m


def _dila_conv_kernel(*refs, kernel_size, dilation, halo, tile_t, batch,
                      c_in, c_out, has_halo):
    # refs (has_halo=True):  x_cur, x_hal, w, b, o
    # refs (has_halo=False): x_cur,        w, b, o
    if has_halo:
        x_cur_ref, x_hal_ref, w_ref, b_ref, o_ref = refs
    else:
        x_cur_ref, w_ref, b_ref, o_ref = refs

    x_cur = x_cur_ref[...]                                 # (B, tile_t, C_in)
    if has_halo:
        # Append the `halo` valid rows of the halo block after the tile.
        xw = jnp.concatenate([x_cur, x_hal_ref[:, :halo, :]], axis=1)
    else:
        xw = x_cur                                         # (B, tile_t+halo, C_in)

    if c_in >= 128:
        # Large C_in: K accumulated matmuls — each tap already has full MXU
        # contraction depth; avoids materializing the (B*tile_t, K*C_in)
        # im2col matrix and the lane-axis concat.
        acc = None
        for k in range(kernel_size):
            xs = xw[:, k * dilation:k * dilation + tile_t, :]
            xs = xs.reshape(batch * tile_t, c_in)
            pk = jnp.dot(xs, w_ref[k * c_in:(k + 1) * c_in, :],
                         preferred_element_type=jnp.float32)
            acc = pk if acc is None else acc + pk
    else:
        # Small/medium C_in: fused im2col -> one MXU matmul per tile.
        taps = [xw[:, k * dilation:k * dilation + tile_t, :]
                for k in range(kernel_size)]
        col = taps[0] if kernel_size == 1 else jnp.concatenate(taps, axis=-1)
        col = col.reshape(batch * tile_t, kernel_size * c_in)
        acc = jnp.dot(col, w_ref[...], preferred_element_type=jnp.float32)

    acc = acc + b_ref[...]                                 # f32 bias add
    # Single lane-dense-as-possible store of the whole tile (sublane = tile_t).
    o_ref[...] = acc.reshape(batch, tile_t, c_out).astype(o_ref.dtype)


def dila_conv_forward(x, weight, bias, dilation, *, tile_t=512,
                      compute_dtype=jnp.bfloat16,
                      vmem_budget_bytes=28 * 1024 * 1024):
    """x: (B, T, C_in); weight: (C_out, C_in, K) [PyTorch Conv1d layout];
    bias: (C_out,). Returns (T_out, B, C_out), matching dila_conv.forward."""
    B, T, c_in = x.shape
    c_out, c_in_w, K = weight.shape
    assert c_in_w == c_in
    halo = dilation * (K - 1)
    t_out = T - halo
    assert t_out > 0, "sequence too short for this kernel_size/dilation"

    out_dtype = x.dtype
    in_bytes = jnp.dtype(compute_dtype).itemsize
    out_bytes = jnp.dtype(out_dtype).itemsize
    # Sublane alignment: packed dtypes (bf16) tile (16,128), f32 tiles (8,128).
    sub = 16 if in_bytes < 4 else 8
    has_halo = halo > 0
    halo_r = _round_up(halo, sub) if has_halo else 0
    align = halo_r if has_halo else sub

    def vmem_bytes(tt):
        # Double-buffered pipeline blocks + in-kernel temporaries.
        in_blk = B * tt * c_in * in_bytes
        hal_blk = B * halo_r * c_in * in_bytes
        out_blk = B * tt * c_out * out_bytes
        w_blk = K * c_in * c_out * in_bytes + c_out * 4
        pipelined = 2 * (in_blk + hal_blk + out_blk + w_blk)
        xw_tmp = B * (tt + halo_r) * c_in * in_bytes           # concat copy
        col_tmp = B * tt * c_in * in_bytes * (1 if c_in >= 128 else K)
        acc_tmp = B * tt * c_out * 4                           # f32 accumulator
        return pipelined + xw_tmp + col_tmp + acc_tmp

    # Tile geometry: multiples of `align` keep every BlockSpec (8/16,128)-
    # aligned and make the halo index map a plain block index.
    tile_t = max(align, min(tile_t, _round_up(t_out, align)))
    tile_t = _round_up(tile_t, align)
    # Keep both v7x TensorCores busy: aim for >= 2 tiles when possible.
    if t_out > align:
        tile_t = min(tile_t, _round_up(-(-t_out // 2), align))
    # Shrink until the (blocks + temporaries) estimate fits the VMEM budget
    # (conservative vs. v7x's 64 MiB physical / 32 MiB scoped).
    while tile_t > align and vmem_bytes(tile_t) > vmem_budget_bytes:
        tile_t -= align

    n_tiles = -(-t_out // tile_t)
    t_out_pad = n_tiles * tile_t
    # Minimal pad: just enough for the last tile + its halo block (was
    # (n_tiles+1)*tile_t). Skipped entirely when x already covers it.
    t_pad = t_out_pad + halo_r

    x_c = x.astype(compute_dtype)
    if t_pad > T:
        x_c = jnp.pad(x_c, ((0, 0), (0, t_pad - T), (0, 0)))

    # Fused im2col weights: (C_out, C_in, K) -> (K*C_in, C_out), k-major rows.
    w_fused = jnp.transpose(weight, (2, 1, 0)).reshape(K * c_in, c_out)
    w_fused = w_fused.astype(compute_dtype)
    b2 = bias.reshape(1, c_out).astype(jnp.float32)

    in_specs = [pl.BlockSpec((B, tile_t, c_in), lambda i: (0, i, 0))]
    args = [x_c]
    if has_halo:
        hs = tile_t // halo_r                  # halo-block index stride
        in_specs.append(
            pl.BlockSpec((B, halo_r, c_in), lambda i: (0, (i + 1) * hs, 0)))
        args.append(x_c)
    in_specs += [pl.BlockSpec((K * c_in, c_out), lambda i: (0, 0)),
                 pl.BlockSpec((1, c_out), lambda i: (0, 0))]
    args += [w_fused, b2]

    kernel = functools.partial(
        _dila_conv_kernel, kernel_size=K, dilation=dilation, halo=halo,
        tile_t=tile_t, batch=B, c_in=c_in, c_out=c_out, has_halo=has_halo)

    vmem_limit = int(min(48 * 1024 * 1024,
                         max(4 * vmem_bytes(tile_t), 16 * 1024 * 1024)))

    out = pl.pallas_call(
        kernel,
        out_shape=jax.ShapeDtypeStruct((B, t_out_pad, c_out), out_dtype),
        grid=(n_tiles,),
        in_specs=in_specs,
        # Lane-dense output blocks: (tile_t, c_out) -> (sublane, lane).
        out_specs=pl.BlockSpec((B, tile_t, c_out), lambda i: (0, i, 0)),
        compiler_params=pltpu.CompilerParams(
            dimension_semantics=("parallel",),
            vmem_limit_bytes=vmem_limit),
    )(*args)

    out = out[:, :t_out, :] if t_out_pad != t_out else out
    # Final permute to the module's (T_out, B, C_out) layout (done host-side so
    # the kernel store stays dense).
    return jnp.transpose(out, (1, 0, 2))


def _reference(x, weight, bias, dilation):
    """Pure-JAX reference of the same dilated conv1d (for verification)."""
    B, T, c_in = x.shape
    c_out, _, K = weight.shape
    t_out = T - dilation * (K - 1)
    acc = jnp.zeros((B, t_out, c_out), jnp.float32)
    for k in range(K):
        xs = jax.lax.dynamic_slice(x, (0, k * dilation, 0), (B, t_out, c_in))
        acc = acc + jnp.einsum("btc,dc->btd", xs, weight[:, :, k])
    acc = acc + bias[None, None, :]
    return jnp.transpose(acc, (1, 0, 2))


if __name__ == "__main__":
    # Module hyperparameters (small, consistent with the forward semantics).
    B, T, C_IN, C_OUT = 2, 64, 4, 8
    KERNEL_SIZE, DILATION = 3, 2

    key = jax.random.PRNGKey(0)
    kx, kw, kb = jax.random.split(key, 3)

    x = jax.random.normal(kx, (B, T, C_IN), dtype=jnp.float32)

    # Deterministic PyTorch-style Conv1d init: U(-b, b), b = 1/sqrt(fan_in).
    fan_in = C_IN * KERNEL_SIZE
    bound = 1.0 / (fan_in ** 0.5)
    weight = jax.random.uniform(
        kw, (C_OUT, C_IN, KERNEL_SIZE), minval=-bound, maxval=bound,
        dtype=jnp.float32)
    bias = jax.random.uniform(
        kb, (C_OUT,), minval=-bound, maxval=bound, dtype=jnp.float32)

    ref = _reference(x, weight, bias, DILATION)
    t_out = T - DILATION * (KERNEL_SIZE - 1)

    # Exact-logic check with f32 compute (tile_t=32 -> 2 time tiles + halo + pad).
    out_f32 = jax.block_until_ready(
        dila_conv_forward(x, weight, bias, DILATION, tile_t=32,
                          compute_dtype=jnp.float32))
    assert out_f32.shape == (t_out, B, C_OUT)
    assert jnp.allclose(out_f32, ref, atol=1e-5, rtol=1e-5)

    # Production path: bf16 inputs / f32 accumulation (tolerance loosened for
    # bf16 input rounding; accumulation stays f32).
    out_bf16 = jax.block_until_ready(
        dila_conv_forward(x, weight, bias, DILATION, tile_t=32,
                          compute_dtype=jnp.bfloat16))
    assert out_bf16.shape == (t_out, B, C_OUT)
    assert jnp.allclose(out_bf16, ref, atol=5e-2, rtol=5e-2)

    print("KERNEL_OK")
</pallas_src>

<mosaic_0001>
module attributes {stable_mosaic.version = 11 : i64} {
  func.func @_dila_conv_kernel(%arg0: i32, %arg1: memref<2x32x4xf32, #tpu.memory_space<vmem>>, %arg2: memref<2x8x4xf32, #tpu.memory_space<vmem>>, %arg3: memref<12x8xf32, #tpu.memory_space<vmem>>, %arg4: memref<1x8xf32, #tpu.memory_space<vmem>>, %arg5: memref<2x32x8xf32, #tpu.memory_space<vmem>>) attributes {dimension_semantics = [#tpu.dimension_semantics<parallel>], iteration_bounds = array<i64: 2>, scalar_prefetch = 0 : i64, scratch_operands = 0 : i64, tpu.core_type = #tpu.core_type<tc>, window_params = [{transform_indices = @transform_0, window_bounds = array<i64: 2, 32, 4>}, {transform_indices = @transform_1, window_bounds = array<i64: 2, 8, 4>}, {pipeline_mode = #tpu.pipeline_mode<synchronous>, transform_indices = @transform_2, window_bounds = array<i64: 12, 8>}, {pipeline_mode = #tpu.pipeline_mode<synchronous>, transform_indices = @transform_3, window_bounds = array<i64: 1, 8>}, {transform_indices = @transform_4, window_bounds = array<i64: 2, 32, 8>}]} {
    %c0 = arith.constant 0 : index
    %c0_0 = arith.constant 0 : index
    %c0_1 = arith.constant 0 : index
    %0 = vector.load %arg1[%c0, %c0_0, %c0_1] : memref<2x32x4xf32, #tpu.memory_space<vmem>>, vector<2x32x4xf32>
    %c0_2 = arith.constant 0 : index
    %c0_3 = arith.constant 0 : index
    %c0_4 = arith.constant 0 : index
    %1 = vector.load %arg2[%c0_2, %c0_3, %c0_4] : memref<2x8x4xf32, #tpu.memory_space<vmem>>, vector<2x4x4xf32>
    %2 = tpu.concatenate %0, %1 in 1 : vector<2x32x4xf32>, vector<2x4x4xf32> -> vector<2x36x4xf32>
    %3 = vector.extract_strided_slice %2 {offsets = [0, 0, 0], sizes = [2, 32, 4], strides = [1, 1, 1]} : vector<2x36x4xf32> to vector<2x32x4xf32>
    %4 = vector.extract_strided_slice %2 {offsets = [0, 2, 0], sizes = [2, 32, 4], strides = [1, 1, 1]} : vector<2x36x4xf32> to vector<2x32x4xf32>
    %5 = vector.extract_strided_slice %2 {offsets = [0, 4, 0], sizes = [2, 32, 4], strides = [1, 1, 1]} : vector<2x36x4xf32> to vector<2x32x4xf32>
    %6 = tpu.concatenate %3, %4, %5 in 2 : vector<2x32x4xf32>, vector<2x32x4xf32>, vector<2x32x4xf32> -> vector<2x32x12xf32>
    %7 = vector.shape_cast %6 : vector<2x32x12xf32> to vector<64x12xf32>
    %c0_5 = arith.constant 0 : index
    %c0_6 = arith.constant 0 : index
    %8 = vector.load %arg3[%c0_5, %c0_6] : memref<12x8xf32, #tpu.memory_space<vmem>>, vector<12x8xf32>
    %cst = arith.constant dense<0.000000e+00> : vector<64x8xf32>
    %9 = tpu.matmul %7, %8, %cst {dimension_numbers = #tpu.dot_dimension_numbers<[1], [0], [0], [1], [0, 0, 1, 1], [], []>} : vector<64x12xf32>, vector<12x8xf32>, vector<64x8xf32> -> vector<64x8xf32>
    %c0_7 = arith.constant 0 : index
    %c0_8 = arith.constant 0 : index
    %10 = vector.load %arg4[%c0_7, %c0_8] : memref<1x8xf32, #tpu.memory_space<vmem>>, vector<1x8xf32>
    %11 = vector.broadcast %10 : vector<1x8xf32> to vector<64x8xf32>
    %12 = arith.addf %9, %11 : vector<64x8xf32>
    %13 = vector.shape_cast %12 : vector<64x8xf32> to vector<2x32x8xf32>
    %c0_9 = arith.constant 0 : index
    %c0_10 = arith.constant 0 : index
    %c0_11 = arith.constant 0 : index
    %14 = vector.load %arg5[%c0_9, %c0_10, %c0_11] : memref<2x32x8xf32, #tpu.memory_space<vmem>>, vector<2x32x8xf32>
    tpu.vector_store %arg5[%c0_9, %c0_10, %c0_11], %13 {strides = array<i32>} : memref<2x32x8xf32, #tpu.memory_space<vmem>>, vector<2x32x8xf32>,
    return
  }
  func.func @transform_0(%arg0: i32) -> (i32, i32, i32) {
    %c0_i32 = arith.constant 0 : i32
    %c0_i32_0 = arith.constant 0 : i32
    %c0_i32_1 = arith.constant 0 : i32
    return %c0_i32, %arg0, %c0_i32_0 : i32, i32, i32
  }
  func.func @transform_1(%arg0: i32) -> (i32, i32, i32) {
    %c1_i32 = arith.constant 1 : i32
    %0 = arith.addi %arg0, %c1_i32 : i32
    %c4_i32 = arith.constant 4 : i32
    %1 = arith.muli %0, %c4_i32 : i32
    %c0_i32 = arith.constant 0 : i32
    %c0_i32_0 = arith.constant 0 : i32
    %c0_i32_1 = arith.constant 0 : i32
    return %c0_i32, %1, %c0_i32_0 : i32, i32, i32
  }
  func.func @transform_2(%arg0: i32) -> (i32, i32) {
    %c0_i32 = arith.constant 0 : i32
    %c0_i32_0 = arith.constant 0 : i32
    %c0_i32_1 = arith.constant 0 : i32
    return %c0_i32, %c0_i32_0 : i32, i32
  }
  func.func @transform_3(%arg0: i32) -> (i32, i32) {
    %c0_i32 = arith.constant 0 : i32
    %c0_i32_0 = arith.constant 0 : i32
    %c0_i32_1 = arith.constant 0 : i32
    return %c0_i32, %c0_i32_0 : i32, i32
  }
  func.func @transform_4(%arg0: i32) -> (i32, i32, i32) {
    %c0_i32 = arith.constant 0 : i32
    %c0_i32_0 = arith.constant 0 : i32
    %c0_i32_1 = arith.constant 0 : i32
    return %c0_i32, %arg0, %c0_i32_0 : i32, i32, i32
  }
}

</mosaic_0001>

<bundles_post_ra>
// kernel: tpu_custom_call.1
= control target key start
LH: loop header
LB: loop body
LE: loop exit
PB: predicated region body
PF: predicated region fallthrough
CT: control target
= control target key end

     0   :  { %s1199_s15 = smov 0   ;;  %s1201_s16 = smov 0   ;;  %s1508_s0 = inlined_call_operand.vmem [shape: f32[2,72,4], index: 0, kind: input, shape index: {}]   ;;  %s1509_s1 = inlined_call_operand.vmem [shape: f32[2,72,4], index: 1, kind: input, shape index: {}]   ;;  %s1510_s2 = inlined_call_operand.vmem [shape: f32[12,8], index: 2, kind: input, shape index: {}]   ;;  %s1511_s3 = inlined_call_operand.vmem [shape: f32[1,8], index: 3, kind: input, shape index: {}]   ;;  %s1512_s4 = inlined_call_operand.vmem [shape: f32[2,64,8], index: 4, kind: output, shape index: {}]  }
   0x1   :  { %s1203_s17 = smov 0   ;;  %s1205_s18 = smov 0  }
   0x2   :  { %s1207_s19 = smov 0  }
   0x3 LB: > { %s872_s20 = sadd.s32 4294967295, %s1137_s19   ;;  %s1226_s21 = sadd.s32 1, %s1137_s19   ;;  %s1137_s19 = sphi %s1207_s19, %s1524_s19   ;;  %s1133_s18 = sphi %s1205_s18, %s1523_s18   ;;  %s1129_s17 = sphi %s1203_s17, %s1522_s17   ;;  %s1125_s16 = sphi %s1201_s16, %s1521_s16   ;;  %s1121_s15 = sphi %s1199_s15, %s1520_s15  }
   0x4   : > { %s18_s22 = ssub.s32 %s1137_s19, %s1226_s21  ;;  %s21_s23 = sadd.s32 1, %s1133_s18 }
   0x5   : > { %p19_p0 = scmp.eq.s32.totalorder %s18_s22, 0  ;;  %p28_p1 = scmp.ne.s32.totalorder %s1133_s18, %s1129_s17 }
   0x6   : > { %p29_p2 = scmp.eq.s32.totalorder %s1137_s19, 0  ;;  %s916_s24 = sshll.u32 %s1137_s19, 2 }
   0x7   : > { %s1236_s25 = scalar_select %p19_p0, %s1133_s18, %s21_s23  }
   0x8   : > { %p30_p3 = por %p29_p2, %p28_p1  ;;  %s917_s26 = sadd.s32 4, %s916_s24 }
   0x9   : > { %s919_s27 = sadd.s32 4, %s917_s26  ;;  %s51_s28 = sadd.s32 1, %s1125_s16 }
   0xa   : > { %s48_s29 = ssub.s32 %s917_s26, %s919_s27  ;;  %p58_p4 = scmp.ne.s32.totalorder %s1125_s16, %s1121_s15 }
   0xb   : > { %p49_p5 = scmp.eq.s32.totalorder %s48_s29, 0  ;;  %p130_p6 = scmp.eq.s32.totalorder %s872_s20, 1 }
   0xc   : > { %p1246_p7 = por %p58_p4, %p29_p2  ;;  %p877_p9 = scmp.ge.s32.totalorder %s1137_s19, 2 }
   0xd   : > { %s1251_s5 = scalar_select %p49_p5, %s1125_s16, %s51_s28  }
   0xe   : > { %p1256_p8 = por %p130_p6, %p28_p1  ;;  %158 = sbr.rel (%p877_p9) target bundleno = 84 (0x54), region = 24 }
  0x15   : > { %161 = sbr.rel (!%p30_p3) target bundleno = 77 (0x4d), region = 28  ;;  %s163_s7 = sand.u32 (%p30_p3), 1, %s1133_s18  }
  0x16   : > { %s167_s8 = ssub.s32 (%p30_p3), 9, %s916_s24  ;;  %s878_s9 = sshll.u32 (%p30_p3), %s163_s7, 6 }
  0x17   : > { %p168_p10 = scmp.lt.s32.totalorder (%p30_p3), %s167_s8, 4  ;;  %s920_s10 = sshll.u32 (%p30_p3), %s1137_s19, 5 }
  0x18   : > { %s1268_s13 = scalar_lea.vmem (%p30_p3), %s1508_s0, %s920_s10   ;;  %s1271_s22 = scalar_lea.vmem (%p30_p3), [#allocation2], %s878_s9  }
  0x1c   : > { %s1526_s8 = smov (!%p168_p10, %s167_s8), 4 }
  0x1d   : > { %s880_s14 = sshll.u32 %s1526_s8, 8 }
  0x1e   : > { %p883_p11 = scmp.eq.s32.totalorder %s880_s14, 0 }
  0x1f   : > { %s1274_s23 = sshrl.u32 (!%p883_p11), %s1526_s8, 2 }
  0x20   : > { %176 = sbr.rel (%p883_p11) target bundleno = 77 (0x4d), region = 32  ;;  %p884_p12 = scmp.le.s32.totalorder (!%p883_p11), %s1274_s23, 0 }
  0x27   : > { %823 = sbr.rel (%p884_p12) target bundleno = 56 (0x38), region = 209  ;;  %s1515_s24 = smov (!%p884_p12), %s1271_s22 }
  0x28   : > { %s1516_s26 = smov (!%p884_p12), %s1268_s13  ;;  %s1283_s27 = smov (!%p884_p12), 0  }
  0x29   : > { %s1285_s28 = smov (!%p884_p12), 0  }
  0x2e LB: >> { %v254_v0 = vld [vmem:[%s1145_s26] sm:$0xff]  ;;  %v256_v1 = vld [vmem:[%s1145_s26 + $0x8] sm:$0xff]  ;;  %v258_v2 = vld [vmem:[%s1145_s26 + $0x10] sm:$0xff]  ;;  %s270_s29 = sadd.s32 1, %s1149_s27  ;;  %s248_s28 = sadd.s32 1, %s1153_s28   ;;  %s1153_s28 = sphi %s1285_s28, %s248_s28   ;;  %s1149_s27 = sphi %s1283_s27, %s1517_s27   ;;  %s1145_s26 = sphi %s1516_s26, %s275_s26   ;;  %s1141_s24 = sphi %s1515_s24, %s276_s24  }
  0x2f   : >> { %255 = vst [vmem:[%s1141_s24] sm:$0xff] %v254_v0  ;;  %257 = vst [vmem:[%s1141_s24 + $0x8] sm:$0xff] %v256_v1  ;;  %v260_v3 = vld [vmem:[%s1145_s26 + $0x18] sm:$0xff]  ;;  %v262_v4 = vld [vmem:[%s1145_s26 + $0x48] sm:$0xff]  ;;  %p271_p13 = scmp.ge.s32.totalorder %s270_s29, %s1274_s23  ;;  %p247_p0 = scmp.ge.s32.totalorder %s248_s28, %s1274_s23 }
  0x30   : >> { %259 = vst [vmem:[%s1141_s24 + $0x10] sm:$0xff] %v258_v2  ;;  %v264_v5 = vld [vmem:[%s1145_s26 + $0x50] sm:$0xff]  ;;  %261 = vst [vmem:[%s1141_s24 + $0x18] sm:$0xff] %v260_v3  ;;  %v266_v6 = vld [vmem:[%s1145_s26 + $0x58] sm:$0xff] }
  0x31   : >> { %263 = vst [vmem:[%s1141_s24 + $0x20] sm:$0xff] %v262_v4  ;;  %265 = vst [vmem:[%s1141_s24 + $0x28] sm:$0xff] %v264_v5  ;;  %v268_v7 = vld [vmem:[%s1145_s26 + $0x60] sm:$0xff]  ;;  %s1528_s29 = smov (%p271_p13, %s270_s29), 0  ;;  %250 = sbr.rel (!%p247_p0) target bundleno = 46 (0x2e), region = 215 }
  0x32   : >> { %267 = vst [vmem:[%s1141_s24 + $0x30] sm:$0xff] %v266_v6  ;;  %269 = vst [vmem:[%s1141_s24 + $0x38] sm:$0xff] %v268_v7  ;;  %s885_s7 = sshll.u32 %s1528_s29, 5  ;;  %s1517_s27 = smov %s1528_s29 }
  0x33   : >> { %s275_s26 = scalar_lea.vmem %s1268_s13, %s885_s7   ;;  %s276_s24 = scalar_lea.vmem %s1271_s22, %s885_s7 [#allocation2]  }
  0x38 PF: > { %s1304_s9 = sand.u32 3, %s1526_s8   ;;  %s921_s10 = sshll.u32 %s1274_s23, 5 }
  0x39   : > { %s1308_s11 = scalar_lea.vmem %s1268_s13, %s921_s10   ;;  %s283_s12 = scalar_lea.vmem %s1271_s22, %s921_s10 [#allocation2]  }
  0x3a   : > { %p890_p1 = scmp.le.s32.totalorder %s1304_s9, 0 }
  0x3b   : > { %s1155_s14 = smov (!%p890_p1), %s283_s12   ;;  %s1159_s29 = smov (!%p890_p1), %s1308_s11  }
  0x3c   : > { %837 = sbr.rel (%p890_p1) target bundleno = 77 (0x4d), region = 220  ;;  %s1163_s7 = smov (!%p890_p1), 0  }
  0x3d   : > { %s1167_s28 = smov (!%p890_p1), 0  }
  0x43 LB: >> { %v293_v8 = vld [vmem:[%s1161_s29] sm:$0xff]  ;;  %v295_v9 = vld [vmem:[%s1161_s29 + $0x48] sm:$0xff]  ;;  %s297_s8 = sadd.s32 1, %s1165_s7  ;;  %s287_s28 = sadd.s32 1, %s1169_s28   ;;  %s1169_s28 = sphi %s1167_s28, %s287_s28   ;;  %s1165_s7 = sphi %s1163_s7, %s1164_s7   ;;  %s1161_s29 = sphi %s1159_s29, %s302_s29   ;;  %s1157_s14 = sphi %s1155_s14, %s303_s14  }
  0x44   : >> { %294 = vst [vmem:[%s1157_s14] sm:$0xff] %v293_v8  ;;  %296 = vst [vmem:[%s1157_s14 + $0x20] sm:$0xff] %v295_v9  ;;  %p298_p2 = scmp.ge.s32.totalorder %s297_s8, %s1304_s9  ;;  %p286_p3 = scmp.ge.s32.totalorder %s287_s28, %s1304_s9 }
  0x46   : >> { %s1530_s8 = smov (%p298_p2, %s297_s8), 0  ;;  %289 = sbr.rel (!%p286_p3) target bundleno = 67 (0x43), region = 226 }
  0x47   : >> { %s891_s13 = sshll.u32 %s1530_s8, 3  ;;  %s1164_s7 = smov %s1530_s8  }
  0x48   : >> { %s302_s29 = scalar_lea.vmem %s1308_s11, %s891_s13   ;;  %s303_s14 = scalar_lea.vmem %s283_s12, %s891_s13 [#allocation2]  }
  0x4d PF: > { %309 = sbr.rel (!%p1246_p7) target bundleno = 84 (0x54), region = 80  ;;  %s311_s22 = sand.u32 (%p1246_p7), 1, %s1125_s16  }
  0x4e   : > { %s894_s23 = sshll.u32 (%p1246_p7), %s1137_s19, 5  ;;  %s893_s24 = sshll.u32 (%p1246_p7), %s311_s22, 4 }
  0x4f   : > { %s792_s10 = scalar_lea.vmem (%p1246_p7), %s1509_s1, %s894_s23  ;;  %s313_s14 = scalar_lea.vmem (%p1246_p7), [#allocation3], %s893_s24 }
  0x50   : > { %v895_v10 = vld [vmem:[%s792_s10 + $0x20] sm:$0xff] (%p1246_p7)  ;;  %v896_v11 = vld [vmem:[%s792_s10 + $0x68] sm:$0xff] (%p1246_p7) }
  0x51   : > { %348 = vst [vmem:[%s313_s14] sm:$0xff] (%p1246_p7), %v895_v10  ;;  %350 = vst [vmem:[%s313_s14 + $0x8] sm:$0xff] (%p1246_p7), %v896_v11 }
  0x54 PF: > { %p897_p4 = scmp.ge.s32.totalorder %s1137_s19, 1  ;;  %p355_p5 = scmp.lt.s32.totalorder %s1137_s19, 3 }
  0x56   : > { %p356_p6 = pnand %p897_p4, %p355_p5 }
  0x57   : > { %s362_s30 = sand.u32 (!%p356_p6), 1, %s1129_s17   ;;  %v529_v12 = vld [vmem:[%s1510_s2] sm:$0xff] (!%p356_p6)  ;;  %vm468_vm0 = vcmask (!%p356_p6), 1043456   ;;  %v530_v13 = vld [vmem:[%s1510_s2 + $0x8] sm:$0xf] (!%p356_p6)  ;;  %vm1171_vm1 = vmmov (!%p356_p6), 1  }
  0x58   : > { %359 = sbr.rel (%p356_p6) target bundleno = 463 (0x1cf), region = 118  ;;  %s1329_s12 = sshll.u32 (!%p356_p6), %s362_s30, 6  ;;  %v952_v14 = vpack.c.bf16 (!%p356_p6), %v530_v13, %v529_v12  ;;  %vm1335_vm2 = vmpackc.low (!%p356_p6), %vm468_vm0, %vm1171_vm1  ;;  %vm425_vm3 = vcmask (!%p356_p6), 1045504   ;;  %vm511_vm4 = vcmask (!%p356_p6), 31744   ;;  %vm520_vm5 = vcmask (!%p356_p6), 64512  }
  0x59   : > { %s1340_s17 = scalar_lea.vmem (!%p356_p6), [#allocation2], %s1329_s12  ;;  %s1172_s28 = smov (!%p356_p6), 4   ;;  %vm538_vm6 = vcmask (!%p356_p6), 97280  }
  0x5a   : > { %v1343_v16 = vld [vmem:[%s1340_s17 + $0x8] sm:$0xff] (!%p356_p6)  ;;  %v1346_v17 = vld [vmem:[%s1340_s17 + $0x10] sm:$0xff] (!%p356_p6)  ;;  %v1349_v18 = vld [vmem:[%s1340_s17] sm:$0xff] (!%p356_p6)  ;;  %954 = vmatprep.subr.msk.bf16.mxu0 (!%p356_p6), %vm1335_vm2, %v952_v14  ;;  %958 = vmatprep.subr.msk.bf16.mxu1 (!%p356_p6), %vm1335_vm2, %v952_v14  ;;  %s369_s8 = sand.u32 (!%p356_p6), 1, %s1121_s15   ;;  %s1173_s22 = smov (!%p356_p6), 8  }
  0x5b   : > { %v427_v19 = vrot.slane (!%p356_p6), %v1343_v16, 2  ;;  %v429_v20 = vrot.slane (!%p356_p6), %v1346_v17, 2  ;;  %v426_v21 = vrot.slane (!%p356_p6), %v1349_v18, 2  ;;  %v1355_v22 = vld [vmem:[%s1340_s17 + $0x28] sm:$0xff] (!%p356_p6)  ;;  %v1358_v23 = vld [vmem:[%s1340_s17 + $0x30] sm:$0xff] (!%p356_p6)  ;;  %v1361_v24 = vld [vmem:[%s1340_s17 + $0x20] sm:$0xff] (!%p356_p6)  ;;  %957 = vmatpush3.bf16.msk.msra.mxu0 (!%p356_p6), %vm1335_vm2, %v952_v14  ;;  %959 = vmatpush3.bf16.msk.msra.mxu1 (!%p356_p6), %vm1335_vm2, %v952_v14 }
  0x5c   : > { %v436_v25 = vrot.slane (!%p356_p6), %v1355_v22, 2  ;;  %v438_v26 = vrot.slane (!%p356_p6), %v1358_v23, 2  ;;  %v435_v27 = vrot.slane (!%p356_p6), %v1361_v24, 2  ;;  %v478_v30 = vrot.slane (!%p356_p6), %v1361_v24, 4  ;;  %s899_s13 = sshll.u32 (!%p356_p6), %s369_s8, 4  ;;  %v1392_v40 = vld [vmem:[%s1340_s17 + $0x38] sm:$0xff] (!%p356_p6) }
  0x5d   : > { %v430_v28 = vsel (!%p356_p6), %vm425_vm3, %v427_v19, %v429_v20  ;;  %v428_v29 = vsel (!%p356_p6), %vm425_vm3, %v426_v21, %v427_v19  ;;  %v479_v31 = vrot.slane (!%p356_p6), %v1355_v22, 4  ;;  %v469_v34 = vrot.slane (!%p356_p6), %v1349_v18, 4  ;;  %v1395_v41 = vld [vmem:[%s1340_s17 + $0x18] sm:$0xff] (!%p356_p6)  ;;  %s371_s15 = scalar_lea.vmem (!%p356_p6), [#allocation3], %s899_s13  ;;  %s1459_s26 = scalar_lea.vmem (!%p356_p6), [#allocation4], %s1329_s12 }
  0x5e   : > { %446 = vrot.lane.b32.xlu1 (!%p356_p6), %v430_v28, %s1172_s28  ;;  %444 = vrot.lane.b32.xlu0 (!%p356_p6), %v428_v29, %s1172_s28  ;;  %v439_v32 = vsel (!%p356_p6), %vm425_vm3, %v436_v25, %v438_v26  ;;  %v437_v33 = vsel (!%p356_p6), %vm425_vm3, %v435_v27, %v436_v25  ;;  %v470_v35 = vrot.slane (!%p356_p6), %v1343_v16, 4  ;;  %v481_v38 = vrot.slane (!%p356_p6), %v1358_v23, 4  ;;  %v414_v46 = vld [vmem:[%s371_s15 + $0x8] sm:$0xf] (!%p356_p6)  ;;  %v413_v47 = vld [vmem:[%s371_s15] sm:$0xf] (!%p356_p6) }
  0x5f   : > { %v480_v36 = vsel %vm468_vm0, %v478_v30, %v479_v31  ;;  %v472_v39 = vrot.slane %v1346_v17, 4  ;;  %v440_v44 = vrot.slane %v1392_v40, 2  ;;  %v431_v45 = vrot.slane %v1395_v41, 2  ;;  %v901_v30 = vld [vmem:[%s1511_s3] ss:$0 sm:$0xff]  ;;  %s923_s27 = sshll.u32 (%p1256_p8), %s872_s20, 5 }
  0x60   : > { %v471_v37 = vsel %vm468_vm0, %v469_v34, %v470_v35  ;;  %v482_v42 = vsel %vm468_vm0, %v479_v31, %v481_v38  ;;  %v442_v50 = vrot.slane %v414_v46, 2  ;;  %v433_v51 = vrot.slane %v413_v47, 2  ;;  %s688_s30 = scalar_lea.vmem (%p1256_p8), %s1512_s4, %s923_s27 }
  0x61   : > { %v473_v43 = vsel %vm468_vm0, %v470_v35, %v472_v39  ;;  %v441_v48 = vsel %vm425_vm3, %v438_v26, %v440_v44  ;;  %v432_v49 = vsel %vm425_vm3, %v429_v20, %v431_v45  ;;  %v483_v54 = vrot.slane %v1392_v40, 4 }
  0x62   : > { %454 = vrot.lane.b32.xlu1 %v439_v32, %s1172_s28  ;;  %452 = vrot.lane.b32.xlu0 %v437_v33, %s1172_s28  ;;  %v443_v52 = vsel %vm425_vm3, %v440_v44, %v442_v50  ;;  %v434_v53 = vsel %vm425_vm3, %v431_v45, %v433_v51  ;;  %v474_v55 = vrot.slane %v1395_v41, 4  ;;  %v485_v58 = vrot.slane %v414_v46, 4 }
  0x63   : > { %v484_v56 = vsel %vm468_vm0, %v481_v38, %v483_v54  ;;  %v476_v59 = vrot.slane %v413_v47, 4 }
  0x64   : > { %v475_v57 = vsel %vm468_vm0, %v472_v39, %v474_v55  ;;  %v486_v60 = vsel %vm468_vm0, %v483_v54, %v485_v58 }
  0x65   : > { %v477_v61 = vsel %vm468_vm0, %v474_v55, %v476_v59 }
  0x66   : > { %495 = vrot.lane.b32.xlu1 %v480_v36, %s1173_s22  ;;  %487 = vrot.lane.b32.xlu0 %v471_v37, %s1173_s22 }
  0x6a   : > { %497 = vrot.lane.b32.xlu1 %v482_v42, %s1173_s22  ;;  %489 = vrot.lane.b32.xlu0 %v473_v43, %s1173_s22 }
  0x6e   : > { %456 = vrot.lane.b32.xlu1 %v441_v48, %s1172_s28  ;;  %448 = vrot.lane.b32.xlu0 %v432_v49, %s1172_s28 }
  0x72   : > { %458 = vrot.lane.b32.xlu1 %v443_v52, %s1172_s28  ;;  %450 = vrot.lane.b32.xlu0 %v434_v53, %s1172_s28 }
  0x76   : > { %499 = vrot.lane.b32.xlu1 %v484_v56, %s1173_s22  ;;  %491 = vrot.lane.b32.xlu0 %v475_v57, %s1173_s22 }
  0x7a   : > { %501 = vrot.lane.b32.xlu1 %v486_v60, %s1173_s22  ;;  %493 = vrot.lane.b32.xlu0 %v477_v61, %s1173_s22 }
  0xd0   : > { %v447_v62 = vpop.permute.xlu1 %446  ;;  %v445_v63 = vpop.permute.xlu0 %444 }
  0xd1   : > { %v512_v2 = vsel %vm511_vm4, %v1349_v18, %v445_v63  ;;  %v513_v8 = vsel %vm511_vm4, %v1343_v16, %v447_v62 }
  0xd4   : > { %v455_v0 = vpop.permute.xlu1 %454  ;;  %v453_v1 = vpop.permute.xlu0 %452 }
  0xd5   : > { %v516_v3 = vsel %vm511_vm4, %v1361_v24, %v453_v1  ;;  %v517_v9 = vsel %vm511_vm4, %v1355_v22, %v455_v0 }
  0xd8   : > { %v496_v4 = vpop.permute.xlu1 %495  ;;  %v488_v5 = vpop.permute.xlu0 %487 }
  0xd9   : > { %v521_v6 = vsel %vm520_vm5, %v512_v2, %v488_v5  ;;  %v525_v7 = vsel %vm520_vm5, %v516_v3, %v496_v4 }
  0xda   : > { %940 = vmatprep.mubr.msk.f32.mxu0 %vm538_vm6, %v521_v6  ;;  %946 = vmatprep.mubr.msk.f32.mxu1 %vm538_vm6, %v525_v7 }
  0xdc   : > { %v498_v10 = vpop.permute.xlu1 %497  ;;  %v490_v11 = vpop.permute.xlu0 %489 }
  0xdd   : > { %v526_v12 = vsel %vm520_vm5, %v517_v9, %v498_v10  ;;  %v522_v13 = vsel %vm520_vm5, %v513_v8, %v490_v11 }
  0xde   : > { %941 = vmatmul.mubr.msk.f32.vlgmr.msra.gmra.mrb[0].mxu0 %vm538_vm6, %v522_v13  ;;  %947 = vmatmul.mubr.msk.f32.vlgmr.msra.gmra.mrb[0].mxu1 %vm538_vm6, %v526_v12 }
  0xe0   : > { %v457_v14 = vpop.permute.xlu1 %456  ;;  %v449_v15 = vpop.permute.xlu0 %448 }
  0xe1   : > { %v518_v16 = vsel %vm511_vm4, %v1358_v23, %v457_v14  ;;  %v514_v20 = vsel %vm511_vm4, %v1346_v17, %v449_v15 }
  0xe4   : > { %v459_v18 = vpop.permute.xlu1 %458  ;;  %v451_v19 = vpop.permute.xlu0 %450 }
  0xe5   : > { %v519_v26 = vsel %vm511_vm4, %v1392_v40, %v459_v18  ;;  %v515_v27 = vsel %vm511_vm4, %v1395_v41, %v451_v19 }
  0xe8   : > { %v500_v21 = vpop.permute.xlu1 %499  ;;  %v492_v22 = vpop.permute.xlu0 %491 }
  0xe9   : > { %v527_v24 = vsel %vm520_vm5, %v518_v16, %v500_v21  ;;  %v523_v25 = vsel %vm520_vm5, %v514_v20, %v492_v22 }
  0xea   : > { %943 = vmatprep.mubr.msk.f32.mxu0 %vm538_vm6, %v523_v25  ;;  %949 = vmatprep.mubr.msk.f32.mxu1 %vm538_vm6, %v527_v24 }
  0xec   : > { %v502_v23 = vpop.permute.xlu1 %501  ;;  %v494_v28 = vpop.permute.xlu0 %493 }
  0xed   : > { %v528_v17 = vsel %vm520_vm5, %v519_v26, %v502_v23  ;;  %v524_v29 = vsel %vm520_vm5, %v515_v27, %v494_v28 }
  0xee   : > { %944 = vmatmul.mubr.msk.f32.gmra.mrb[2].mxu0 %vm538_vm6, %v524_v29  ;;  %950 = vmatmul.mubr.msk.f32.gmra.mrb[2].mxu1 %vm538_vm6, %v528_v17 }
 0x1b1   : > { %v942_v31 = vpop.f32.mrb[0].mxu0  ;;  %v948_v32 = vpop.f32.mrb[0].mxu1 }
 0x1b2   : > { %v638_v33 = vadd.f32 %v942_v31, %v901_v30  ;;  %v658_v34 = vadd.f32 %v948_v32, %v901_v30  ;;  %v632_v35 = vpop.f32.mrb[1].mxu0  ;;  %v652_v36 = vpop.f32.mrb[1].mxu1 }
 0x1b3   : > { %v633_v37 = vadd.f32 %v901_v30, %v632_v35  ;;  %v653_v38 = vadd.f32 %v901_v30, %v652_v36 }
 0x1b4   : > { %672 = vst.msk [vmem:[%s1459_s26 + $0x8] sm:$0xff] %vm520_vm5, %v638_v33  ;;  %676 = vst.msk [vmem:[%s1459_s26 + $0x28] sm:$0xff] %vm520_vm5, %v658_v34 }
 0x1b5   : > { %671 = vst.msk [vmem:[%s1459_s26] sm:$0xff] %vm520_vm5, %v633_v37  ;;  %675 = vst.msk [vmem:[%s1459_s26 + $0x20] sm:$0xff] %vm520_vm5, %v653_v38 }
 0x1bb   : > { %v732_v48 = vld [vmem:[%s1459_s26 + $0x8] sm:$0xff] (%p1256_p8) }
 0x1bc   : > { %v730_v47 = vld [vmem:[%s1459_s26] sm:$0xff] (%p1256_p8)  ;;  %v740_v52 = vld [vmem:[%s1459_s26 + $0x28] sm:$0xff] (%p1256_p8)  ;;  %733 = vst [vmem:[%s688_s30 + $0x8] sm:$0xff] (%p1256_p8), %v732_v48 }
 0x1bd   : > { %v738_v51 = vld [vmem:[%s1459_s26 + $0x20] sm:$0xff] (%p1256_p8)  ;;  %731 = vst [vmem:[%s688_s30] sm:$0xff] (%p1256_p8), %v730_v47  ;;  %741 = vst [vmem:[%s688_s30 + $0x48] sm:$0xff] (%p1256_p8), %v740_v52 }
 0x1be   : > { %739 = vst [vmem:[%s688_s30 + $0x40] sm:$0xff] (%p1256_p8), %v738_v51 }
 0x1bf   : > { %685 = sbr.rel (!%p1256_p8) target bundleno = 463 (0x1cf), region = 130 }
 0x1c1   : > { %v945_v39 = vpop.f32.mrb[2].mxu0  ;;  %v951_v40 = vpop.f32.mrb[2].mxu1 }
 0x1c2   : > { %v648_v41 = vadd.f32 %v945_v39, %v901_v30  ;;  %v668_v42 = vadd.f32 %v951_v40, %v901_v30  ;;  %v642_v43 = vpop.f32.mrb[3].mxu0  ;;  %v662_v44 = vpop.f32.mrb[3].mxu1 }
 0x1c3   : > { %v643_v45 = vadd.f32 %v901_v30, %v642_v43  ;;  %v663_v46 = vadd.f32 %v901_v30, %v662_v44 }
 0x1c4   : > { %674 = vst.msk [vmem:[%s1459_s26 + $0x18] sm:$0xff] %vm520_vm5, %v648_v41  ;;  %678 = vst.msk [vmem:[%s1459_s26 + $0x38] sm:$0xff] %vm520_vm5, %v668_v42 }
 0x1c5   : > { %673 = vst.msk [vmem:[%s1459_s26 + $0x10] sm:$0xff] %vm520_vm5, %v643_v45  ;;  %677 = vst.msk [vmem:[%s1459_s26 + $0x30] sm:$0xff] %vm520_vm5, %v663_v46 }
 0x1cb   : > { %v736_v50 = vld [vmem:[%s1459_s26 + $0x18] sm:$0xff] }
 0x1cc   : > { %v734_v49 = vld [vmem:[%s1459_s26 + $0x10] sm:$0xff]  ;;  %737 = vst [vmem:[%s688_s30 + $0x18] sm:$0xff] %v736_v50  ;;  %v744_v54 = vld [vmem:[%s1459_s26 + $0x38] sm:$0xff] }
 0x1cd   : > { %735 = vst [vmem:[%s688_s30 + $0x10] sm:$0xff] %v734_v49  ;;  %v742_v53 = vld [vmem:[%s1459_s26 + $0x30] sm:$0xff]  ;;  %745 = vst [vmem:[%s688_s30 + $0x58] sm:$0xff] %v744_v54 }
 0x1ce   : > { %743 = vst [vmem:[%s688_s30 + $0x50] sm:$0xff] %v742_v53 }
 0x1cf PF: > { %p11_p7 = scmp.ge.s32.totalorder %s1226_s21, 4   ;;  %s1520_s15 = smov %s1125_s16 }
 0x1d0   : > { %s1521_s16 = smov %s1251_s5  ;;  %s1522_s17 = smov %s1133_s18 }
 0x1d1   : > { %s1523_s18 = smov %s1236_s25  ;;  %s1524_s19 = smov %s1226_s21 }
 0x1d2   :  { %13 = sbr.rel (!%p11_p7) target bundleno = 3 (0x3), region = 237 }

</bundles_post_ra>
